<compile_context>
chip_gen: v5e
topology: v5e:2x2
jax: 0.10.0
libtpu: 0.0.40
codegen_flags: <defaults>
</compile_context>

<pallas_src>
import functools

import jax
import jax.numpy as jnp
from jax import lax
from jax.experimental import pallas as pl
from jax.experimental.pallas import tpu as pltpu

_LANES = 128
_GAMMA = 1e-10


def _round_up(x: int, m: int) -> int:
    return ((x + m - 1) // m) * m


def _cdiv(a: int, b: int) -> int:
    return (a + b - 1) // b


def _device_defaults(itemsize: int):
    """(max_tile_rows, num_splits) tuned per TPU generation."""
    kind = ""
    try:
        kind = jax.devices()[0].device_kind.lower()
    except Exception:  # defensive: fall back to the conservative settings
        pass
    if "v7" in kind or "7x" in kind:
        base, splits = 8192, 2   # 2 TensorCores, 3.2 TB/s HBM, 64 MiB VMEM/TC
    elif "v6" in kind:
        base, splits = 4096, 1
    else:                        # v5e & unknown: conservative scoped-VMEM default
        base, splits = 2048, 1
    if itemsize == 2:            # bf16/f16: half the bytes -> double the rows
        base *= 2
    elif itemsize == 1:
        base *= 4
    return base, splits


def _pick_sub_rows(tile_rows: int) -> int:
    """Largest divisor of tile_rows that is a multiple of 8 and <= 512."""
    if tile_rows % 8 != 0:
        return tile_rows
    for cand in range(min(tile_rows, 512), 0, -8):
        if tile_rows % cand == 0:
            return cand
    return tile_rows


def _bpr_loss_kernel(p_ref, n_ref, out_ref, *, tile_rows, sub_rows,
                     steps_per_split, full_rows, rem_cols, needs_mask,
                     gamma, approx_recip):
    c = pl.program_id(0)                     # parallel split (TC shard on v7x)
    i = pl.program_id(1)                     # reduction step within the split
    block_idx = c * steps_per_split + i      # logical row-block index

    @pl.when(i == 0)
    def _init():
        out_ref[...] = jnp.zeros_like(out_ref)

    num_sub = tile_rows // sub_rows          # static; sub_rows divides tile_rows

    def chunk_term(row0, nrows):
        # -log(gamma + sigmoid(p - n)) for rows [row0, row0 + nrows) of the tile.
        p = p_ref[pl.ds(row0, nrows), :].astype(jnp.float32)
        q = n_ref[pl.ds(row0, nrows), :].astype(jnp.float32)
        d = p - q
        sig = pl.reciprocal(1.0 + jnp.exp(-d), approx=approx_recip)
        return -jnp.log(jnp.float32(gamma) + sig)

    def mask_term(term, row0, nrows):
        # Row-space index math (no *128) keeps int32 safe for huge inputs.
        grow = (block_idx * tile_rows + row0
                + lax.broadcasted_iota(jnp.int32, (nrows, _LANES), 0))
        valid = grow < full_rows
        if rem_cols:
            col = lax.broadcasted_iota(jnp.int32, (nrows, _LANES), 1)
            valid = valid | ((grow == full_rows) & (col < rem_cols))
        return jnp.where(valid, term, jnp.float32(0.0))

    def accumulate(masked):
        if sub_rows % 8 == 0:
            def partial_sum(row0, nrows):
                t = chunk_term(row0, nrows)
                if masked:
                    t = mask_term(t, row0, nrows)
                # Fold onto (8, 128): pure element-wise VPU adds, no XLU work.
                return jnp.sum(t.reshape(nrows // 8, 8, _LANES), axis=0)

            if num_sub == 1:
                acc = partial_sum(0, tile_rows)
            else:
                def body(s, acc):
                    r0 = pl.multiple_of(s * sub_rows, sub_rows)
                    return acc + partial_sum(r0, sub_rows)
                acc = lax.fori_loop(0, num_sub, body,
                                    jnp.zeros((8, _LANES), jnp.float32),
                                    unroll=num_sub <= 4)
            out_ref[...] += acc[None]
        else:
            # Tiny block (< 8 rows, whole array): one XLU reduce, runs once.
            t = chunk_term(0, tile_rows)
            if masked:
                t = mask_term(t, 0, tile_rows)
            row_sum = jnp.sum(t, axis=0)                         # (128,)
            sub_id = lax.broadcasted_iota(jnp.int32, (8, _LANES), 0)
            out_ref[...] += jnp.where(sub_id == 0, row_sum[None, :], 0.0)[None]

    if not needs_mask:
        accumulate(False)                    # no mask code emitted at all
    else:
        in_range = (block_idx + 1) * tile_rows <= full_rows

        @pl.when(in_range)
        def _fast():
            accumulate(False)

        @pl.when(jnp.logical_not(in_range))
        def _tail():
            accumulate(True)


def bpr_loss(p_score: jax.Array, n_score: jax.Array, *,
             max_tile_rows: int | None = None, num_splits: int | None = None,
             gamma: float = _GAMMA, approx_reciprocal: bool = False) -> jax.Array:
    """Pallas TPU implementation of BPRLoss().forward(p_score, n_score)."""
    assert p_score.shape == n_score.shape, "p_score and n_score must match"
    n = int(p_score.size)
    assert n > 0, "BPRLoss of an empty tensor is undefined"

    dtype = jnp.result_type(p_score.dtype, n_score.dtype)
    itemsize = jnp.dtype(dtype).itemsize

    auto_rows, auto_splits = _device_defaults(itemsize)
    if max_tile_rows is None:
        max_tile_rows = auto_rows
    if num_splits is None:
        num_splits = auto_splits
    num_splits = max(1, int(num_splits))
    max_tile_rows = max(8, (int(max_tile_rows) // 8) * 8)

    full_rows, rem_cols = divmod(n, _LANES)
    rows = full_rows + (1 if rem_cols else 0)

    p_flat = p_score.astype(dtype).reshape(-1)
    n_flat = n_score.astype(dtype).reshape(-1)
    if rem_cols:
        # Awkward (non multiple-of-128) sizes only: pad the tail up to one
        # 128-lane row (this is the only path that copies the inputs).
        pad = rows * _LANES - n
        p_flat = jnp.pad(p_flat, (0, pad))
        n_flat = jnp.pad(n_flat, (0, pad))
    p2 = p_flat.reshape(rows, _LANES)        # zero-copy reshape when rem == 0
    n2 = n_flat.reshape(rows, _LANES)

    # Biggest block that fits the per-chip VMEM budget, shrunk so every split
    # (TensorCore) gets work; never larger than the array.
    tile_rows = min(max_tile_rows, rows)
    if num_splits > 1:
        tile_rows = min(tile_rows, _round_up(_cdiv(rows, num_splits), 8))
    tile_rows = max(1, tile_rows)
    sub_rows = _pick_sub_rows(tile_rows)

    steps_per_split = _cdiv(rows, num_splits * tile_rows)
    num_row_blocks = _cdiv(rows, tile_rows)
    last_block = num_row_blocks - 1
    grid = (num_splits, steps_per_split)

    # If the logical grid covers the input exactly, skip all masking code.
    coverage = num_splits * steps_per_split * tile_rows * _LANES
    needs_mask = coverage != n

    def in_map(c, i):
        # Clamp out-of-range blocks (possible when rows don't split evenly);
        # their contribution is masked to zero inside the kernel.
        return (jnp.minimum(c * steps_per_split + i, last_block), 0)

    kernel = functools.partial(
        _bpr_loss_kernel,
        tile_rows=tile_rows,
        sub_rows=sub_rows,
        steps_per_split=steps_per_split,
        full_rows=full_rows,
        rem_cols=rem_cols,
        needs_mask=needs_mask,
        gamma=float(gamma),
        approx_recip=bool(approx_reciprocal),
    )

    interm_rows = sub_rows if sub_rows % 8 == 0 else tile_rows
    vmem_limit = (2 * 2 * tile_rows * _LANES * itemsize        # input double-buffers
                  + 6 * interm_rows * _LANES * 4               # body intermediates
                  + (4 << 20))                                 # slack
    vmem_limit = int(min(max(vmem_limit, 24 << 20), 48 << 20))

    partials = pl.pallas_call(
        kernel,
        out_shape=jax.ShapeDtypeStruct((num_splits, 8, _LANES), jnp.float32),
        grid_spec=pltpu.PrefetchScalarGridSpec(
            num_scalar_prefetch=0,
            grid=grid,
            in_specs=[
                pl.BlockSpec((tile_rows, _LANES), in_map),
                pl.BlockSpec((tile_rows, _LANES), in_map),
            ],
            out_specs=pl.BlockSpec((1, 8, _LANES), lambda c, i: (c, 0, 0)),
        ),
        compiler_params=pltpu.CompilerParams(
            dimension_semantics=("parallel", "arbitrary"),
            vmem_limit_bytes=vmem_limit,
        ),
        cost_estimate=pl.CostEstimate(
            flops=6 * n,
            transcendentals=2 * n,
            bytes_accessed=2 * n * itemsize + num_splits * 8 * _LANES * 4,
        ),
    )(p2, n2)

    # Single cross-lane reduce + mean scaling, once, outside the hot loop.
    return jnp.sum(partials) / jnp.float32(n)


def _reference(p, n, gamma=_GAMMA):
    d = p.astype(jnp.float32) - n.astype(jnp.float32)
    return -jnp.mean(jnp.log(gamma + jax.nn.sigmoid(d)))


if __name__ == "__main__":
    key = jax.random.PRNGKey(0)

    cases = [
        # (shape, dtype, bpr_loss kwargs)
        ((16, 64), jnp.float32, {}),                                        # aligned, single block
        ((16, 64), jnp.bfloat16, {}),                                       # bf16 inputs
        ((8, 32), jnp.float32, {}),                                         # tiny (<8 rows) block
        ((7, 19), jnp.float32, dict(num_splits=2, max_tile_rows=8)),        # ragged + 2-way split
        ((64, 2048), jnp.float32, dict(num_splits=1, max_tile_rows=1024)),  # sub-chunked tile loop
        ((50, 333), jnp.float32, dict(num_splits=1, max_tile_rows=48)),     # multi-step + partial last block
    ]
    for idx, (shape, dtype, kw) in enumerate(cases):
        kp, kn = jax.random.split(jax.random.fold_in(key, idx))
        p = jax.random.normal(kp, shape, dtype=jnp.float32).astype(dtype)
        q = jax.random.normal(kn, shape, dtype=jnp.float32).astype(dtype)
        loss = jax.block_until_ready(bpr_loss(p, q, **kw))
        ref = _reference(p, q)
        assert jnp.allclose(loss, ref, rtol=2e-5, atol=1e-6), (shape, dtype, loss, ref)

    print("KERNEL_OK")
</pallas_src>

<mosaic_0001>
module attributes {stable_mosaic.version = 11 : i64} {
  func.func @_bpr_loss_kernel(%arg0: i32, %arg1: i32, %arg2: memref<8x128xf32, #tpu.memory_space<vmem>>, %arg3: memref<8x128xf32, #tpu.memory_space<vmem>>, %arg4: memref<1x8x128xf32, #tpu.memory_space<vmem>>) attributes {dimension_semantics = [#tpu.dimension_semantics<parallel>, #tpu.dimension_semantics<arbitrary>], iteration_bounds = array<i64: 1, 1>, scalar_prefetch = 0 : i64, scratch_operands = 0 : i64, tpu.core_type = #tpu.core_type<tc>, window_params = [{transform_indices = @transform_0, window_bounds = array<i64: 8, 128>}, {transform_indices = @transform_1, window_bounds = array<i64: 8, 128>}, {transform_indices = @transform_2, window_bounds = array<i64: 1, 8, 128>}]} {
    %c0_i32 = arith.constant 0 : i32
    %0 = arith.cmpi eq, %arg1, %c0_i32 : i32
    %1 = arith.extui %0 : i1 to i32
    %c0_i32_0 = arith.constant 0 : i32
    %2 = arith.cmpi ne, %1, %c0_i32_0 : i32
    scf.if %2 {
      %cst_14 = arith.constant 0.000000e+00 : f32
      %23 = vector.broadcast %cst_14 : f32 to vector<1x8x128xf32>
      %c0_15 = arith.constant 0 : index
      %c0_16 = arith.constant 0 : index
      %c0_17 = arith.constant 0 : index
      %24 = vector.load %arg4[%c0_15, %c0_16, %c0_17] : memref<1x8x128xf32, #tpu.memory_space<vmem>>, vector<1x8x128xf32>
      tpu.vector_store %arg4[%c0_15, %c0_16, %c0_17], %23 {strides = array<i32>} : memref<1x8x128xf32, #tpu.memory_space<vmem>>, vector<1x8x128xf32>,
    } else {
    }
    %c0 = arith.constant 0 : index
    %c0_1 = arith.constant 0 : index
    %3 = vector.load %arg2[%c0, %c0_1] : memref<8x128xf32, #tpu.memory_space<vmem>>, vector<8x128xf32>
    %c0_2 = arith.constant 0 : index
    %c0_3 = arith.constant 0 : index
    %4 = vector.load %arg3[%c0_2, %c0_3] : memref<8x128xf32, #tpu.memory_space<vmem>>, vector<8x128xf32>
    %5 = arith.subf %3, %4 : vector<8x128xf32>
    %cst = arith.constant 0.000000e+00 : f32
    %6 = vector.broadcast %cst : f32 to vector<8x128xf32>
    %7 = arith.subf %6, %5 : vector<8x128xf32>
    %8 = math.exp %7 : vector<8x128xf32>
    %cst_4 = arith.constant 1.000000e+00 : f32
    %9 = vector.broadcast %cst_4 : f32 to vector<8x128xf32>
    %10 = arith.addf %9, %8 : vector<8x128xf32>
    %11 = tpu.reciprocal %10 : vector<8x128xf32> -> vector<8x128xf32>
    %cst_5 = arith.constant 1.000000e-10 : f32
    %12 = vector.broadcast %cst_5 : f32 to vector<8x128xf32>
    %13 = arith.addf %12, %11 : vector<8x128xf32>
    %14 = math.log %13 : vector<8x128xf32>
    %cst_6 = arith.constant 0.000000e+00 : f32
    %15 = vector.broadcast %cst_6 : f32 to vector<8x128xf32>
    %16 = arith.subf %15, %14 : vector<8x128xf32>
    %17 = vector.shape_cast %16 : vector<8x128xf32> to vector<1x8x128xf32>
    %cst_7 = arith.constant dense<0.000000e+00> : vector<8x128xf32>
    %18 = vector.multi_reduction <add>, %17, %cst_7 [0] : vector<1x8x128xf32> to vector<8x128xf32>
    %c0_8 = arith.constant 0 : index
    %c0_9 = arith.constant 0 : index
    %c0_10 = arith.constant 0 : index
    %19 = vector.load %arg4[%c0_8, %c0_9, %c0_10] : memref<1x8x128xf32, #tpu.memory_space<vmem>>, vector<1x8x128xf32>
    %20 = vector.shape_cast %18 : vector<8x128xf32> to vector<1x8x128xf32>
    %21 = arith.addf %19, %20 : vector<1x8x128xf32>
    %c0_11 = arith.constant 0 : index
    %c0_12 = arith.constant 0 : index
    %c0_13 = arith.constant 0 : index
    %22 = vector.load %arg4[%c0_11, %c0_12, %c0_13] : memref<1x8x128xf32, #tpu.memory_space<vmem>>, vector<1x8x128xf32>
    tpu.vector_store %arg4[%c0_11, %c0_12, %c0_13], %21 {strides = array<i32>} : memref<1x8x128xf32, #tpu.memory_space<vmem>>, vector<1x8x128xf32>,
    return
  }
  func.func @transform_0(%arg0: i32, %arg1: i32) -> (i32, i32) {
    %c1_i32 = arith.constant 1 : i32
    %0 = arith.muli %arg0, %c1_i32 : i32
    %1 = arith.addi %0, %arg1 : i32
    %c0_i32 = arith.constant 0 : i32
    %2 = arith.minsi %1, %c0_i32 : i32
    %c0_i32_0 = arith.constant 0 : i32
    %c0_i32_1 = arith.constant 0 : i32
    return %2, %c0_i32_0 : i32, i32
  }
  func.func @transform_1(%arg0: i32, %arg1: i32) -> (i32, i32) {
    %c1_i32 = arith.constant 1 : i32
    %0 = arith.muli %arg0, %c1_i32 : i32
    %1 = arith.addi %0, %arg1 : i32
    %c0_i32 = arith.constant 0 : i32
    %2 = arith.minsi %1, %c0_i32 : i32
    %c0_i32_0 = arith.constant 0 : i32
    %c0_i32_1 = arith.constant 0 : i32
    return %2, %c0_i32_0 : i32, i32
  }
  func.func @transform_2(%arg0: i32, %arg1: i32) -> (i32, i32, i32) {
    %c0_i32 = arith.constant 0 : i32
    %c0_i32_0 = arith.constant 0 : i32
    %c0_i32_1 = arith.constant 0 : i32
    return %arg0, %c0_i32, %c0_i32_0 : i32, i32, i32
  }
}

</mosaic_0001>

<bundles_post_ra>
// kernel: tpu_custom_call.1
= control target key start
LH: loop header
LB: loop body
LE: loop exit
PB: predicated region body
PF: predicated region fallthrough
CT: control target
= control target key end

     0   :  { %7 = vsyncpa [#allocation3], 0  ;;  %s227_s0 = inlined_call_operand.hbm [shape: f32[8,128], index: 0, kind: input, shape index: {}]   ;;  %s228_s1 = inlined_call_operand.hbm [shape: f32[8,128], index: 1, kind: input, shape index: {}]   ;;  %s229_s2 = inlined_call_operand.hbm [shape: f32[1,8,128], index: 2, kind: output, shape index: {}]  }
   0x1   :  { %8 = vsyncpa [#allocation6], 0 }
   0x2   :  { %9 = vsyncpa [#allocation4], 0  ;;  %s20_s11 = sshll.u32 %s227_s0, 4  ;;  %s200_s12 = smov [#allocation2]   ;;  %s21_s11 = int_to_ptr.hbm [resolvable:$true] %s20_s11 }
   0x3   :  { %s22_s13 = sshll.u32 %s200_s12, 4  ;;  %s36_s16 = sshll.u32 %s228_s1, 4  ;;  %s23_s13 = int_to_ptr.vmem [resolvable:$true] %s22_s13  ;;  %s37_s16 = int_to_ptr.hbm [resolvable:$true] %s36_s16 }
   0x4   :  { %25 = dma.hbm_to_vmem [thread:$0]  %s21_s11, 128, %s23_s13, [#allocation3]  }
   0x5   :  { %s201_s17 = smov [#allocation5]  }
   0x6   :  { %s38_s18 = sshll.u32 %s201_s17, 4  ;;  %s39_s18 = int_to_ptr.vmem [resolvable:$true] %s38_s18 }
   0x7   :  { %41 = dma.hbm_to_vmem [thread:$0]  %s37_s16, 128, %s39_s18, [#allocation6]  }
   0x8   :  { %194 = dma.done.wait [#allocation3], 128  }
   0x9   :  { %195 = vsyncadd [#allocation3], 4294967168 }
   0xa   :  { %196 = dma.done.wait [#allocation6], 128  }
   0xb   :  { %197 = vsyncadd [#allocation6], 4294967168  ;;  %v61_v0 = vld [vmem:[#allocation2] sm:$0xff]  ;;  %v62_v1 = vld [vmem:[#allocation5] sm:$0xff]  ;;  %s202_s0 = smov [#allocation7]   ;;  %s97_s21 = sshll.u32 %s229_s2, 4  ;;  %s98_s21 = int_to_ptr.hbm [resolvable:$true] %s97_s21 }
   0xc   :  { %v63_v2 = vsub.f32 %v61_v0, %v62_v1  ;;  %s95_s1 = sshll.u32 %s202_s0, 4  ;;  %s96_s1 = int_to_ptr.vmem [resolvable:$true] %s95_s1 }
   0xe   :  { %v64_v3 = vsub.f32 0.0, %v63_v2 }
  0x10   :  { %v65_v4 = vmul.f32 1.442695, %v64_v3 }
  0x12   :  { %116 = vpow2.f32 %v65_v4 }
  0x18   :  { %v117_v5 = vpop.eup %116 }
  0x19   :  { %v67_v6 = vadd.f32 1.0, %v117_v5 }
  0x1b   :  { %118 = vrcp.f32 %v67_v6  ;;  %v79_v9 = vand.u32 2147483648, %v67_v6  ;;  %vm73_vm0 = vweird.f32 %v67_v6  ;;  %v77_v11 = vand.u32 2147483647, %v67_v6 }
  0x1d   :  { %v80_v13 = vor.u32 1.1754944e-38, %v79_v9  ;;  %vm78_vm3 = vcmp.eq.f32.partialorder %v77_v11, 8.507059e+37 }
  0x21   :  { %v119_v7 = vpop.eup %118 }
  0x22   :  { %v69_v8 = vmul.f32 %v119_v7, %v67_v6  ;;  %vm74_vm1 = vweird.f32 %v119_v7 }
  0x23   :  { %vm75_vm2 = vmor %vm73_vm0, %vm74_vm1 }
  0x24   :  { %v70_v10 = vsub.f32 1.0, %v69_v8 }
  0x26   :  { %v71_v12 = vmul.f32 %v119_v7, %v70_v10 }
  0x28   :  { %v72_v14 = vadd.f32 %v119_v7, %v71_v12 }
  0x2a   :  { %v76_v15 = vsel %vm75_vm2, %v119_v7, %v72_v14 }
  0x2b   :  { %v81_v16 = vsel %vm78_vm3, %v80_v13, %v76_v15 }
  0x2c   :  { %v82_v17 = vadd.f32 1e-10, %v81_v16 }
  0x2e   :  { %120 = vlog2.f32 %v82_v17 }
  0x34   :  { %v121_v18 = vpop.eup %120 }
  0x35   :  { %v84_v19 = vmul.f32 0.6931472, %v121_v18 }
  0x37   :  { %v85_v20 = vsub.f32 0.0, %v84_v19 }
  0x39   :  { %89 = vst [vmem:[#allocation7] sm:$0xff] %v85_v20 }
  0x3a   :  { %100 = dma.vmem_to_hbm [thread:$0]  %s96_s1, 128, %s98_s21, [#allocation4]  }
  0x3b   :  { %198 = dma.done.wait [#allocation4], 128  }
  0x3c   :  { %199 = vsyncadd [#allocation4], 4294967168 }
  0x3d   :  { %105 = vsyncpa [#allocation3], 1 }
  0x3e   :  { %106 = vsyncpa [#allocation6], 1 }
  0x3f   :  { %107 = vsyncpa [#allocation4], 1 }

</bundles_post_ra>
